<compile_context>
chip_gen: v7x
topology: tpu7x:2x2x1
jax: 0.10.0
libtpu: 0.0.40
codegen_flags: <defaults>
</compile_context>

<pallas_src>
import math
from functools import partial

import jax
import jax.numpy as jnp
from jax.experimental import pallas as pl
from jax.experimental.pallas import tpu as pltpu


def _round_up(x: int, m: int) -> int:
    return ((x + m - 1) // m) * m


def _rfe_kernel(times_ref, w_ref, out_ref, *, half, dim):
    # times_ref: (tile, 1)   w_ref: (1, half)   out_ref: (tile, dim + 1)
    t32 = times_ref[...].astype(jnp.float32)                          # (tile, 1)
    # Fold 2*pi into the tiny weight row (one small VPU op per tile).
    w2 = w_ref[...].astype(jnp.float32) * jnp.float32(2.0 * math.pi)  # (1, half)
    freqs = t32 * w2                                                  # (tile, half), VPU

    od = out_ref.dtype
    # Direct slice stores, channel order [time, sin, cos] (module semantics).
    out_ref[:, 0:1] = t32.astype(od)
    out_ref[:, 1:1 + half] = jnp.sin(freqs).astype(od)
    out_ref[:, 1 + half:1 + dim] = jnp.cos(freqs).astype(od)


def random_fourier_embed(times: jax.Array, weights: jax.Array,
                         *, tile_rows: int = 2048, out_dtype=None) -> jax.Array:
    """times: (B, N); weights: (dim//2,). Returns (B, N, dim + 1)."""
    B, N = times.shape
    half = weights.shape[0]
    dim = 2 * half
    c_out = dim + 1
    out_dtype = times.dtype if out_dtype is None else jnp.dtype(out_dtype)

    rows = B * N
    # Sublane granularity: 16 covers both f32 (8) and bf16 (16) outputs.
    tile = min(_round_up(tile_rows, 16), _round_up(rows, 16))
    grid = (pl.cdiv(rows, tile),)      # partial last block handled by the pipeline

    t2d = times.reshape(rows, 1)        # free metadata reshape
    w2d = weights.reshape(1, half)

    out = pl.pallas_call(
        partial(_rfe_kernel, half=half, dim=dim),
        out_shape=jax.ShapeDtypeStruct((rows, c_out), out_dtype),
        grid=grid,
        in_specs=[
            pl.BlockSpec((tile, 1), lambda i: (i, 0)),     # times rows, tiled
            pl.BlockSpec((1, half), lambda i: (0, 0)),     # tiny weights, resident
        ],
        # Block minor == full array minor dim (dim + 1): legal, no lane padding,
        # no wrapper strip pass needed afterwards.
        out_specs=pl.BlockSpec((tile, c_out), lambda i: (i, 0)),
        compiler_params=pltpu.CompilerParams(
            dimension_semantics=("parallel",),
        ),
    )(t2d, w2d)

    # Contiguous reshape back to (B, N, dim + 1): no copy, no strip.
    return out.reshape(B, N, c_out)


def random_fourier_embed_ref(times, weights):
    freqs = times[..., None] * weights * (2.0 * math.pi)
    return jnp.concatenate(
        [times[..., None], jnp.sin(freqs), jnp.cos(freqs)], axis=-1
    )


if __name__ == "__main__":
    key = jax.random.PRNGKey(0)
    k_w, k_t, k_w2, k_t2 = jax.random.split(key, 4)

    # Small module-consistent shapes: batch=2, seq=8, dim=32.
    B, N, dim = 2, 8, 32
    assert dim % 2 == 0
    weights = jax.random.normal(k_w, (dim // 2,), dtype=jnp.float32)
    times = jax.random.uniform(k_t, (B, N), dtype=jnp.float32)

    out = jax.block_until_ready(random_fourier_embed(times, weights))
    ref = random_fourier_embed_ref(times, weights)
    assert out.shape == (B, N, dim + 1), out.shape
    assert jnp.allclose(out, ref, atol=1e-5, rtol=1e-5), "mismatch vs reference"

    # Larger shape exercising a multi-step (megacore-shardable) grid.
    B2, N2, dim2 = 4, 1024, 64
    weights2 = jax.random.normal(k_w2, (dim2 // 2,), dtype=jnp.float32)
    times2 = jax.random.uniform(k_t2, (B2, N2), dtype=jnp.float32)
    out2 = jax.block_until_ready(random_fourier_embed(times2, weights2))
    ref2 = random_fourier_embed_ref(times2, weights2)
    assert out2.shape == (B2, N2, dim2 + 1), out2.shape
    assert jnp.allclose(out2, ref2, atol=1e-4, rtol=1e-5), "mismatch vs reference (large)"

    print("KERNEL_OK")
</pallas_src>

<mosaic_0001>
module attributes {stable_mosaic.version = 11 : i64} {
  func.func @_rfe_kernel(%arg0: i32, %arg1: memref<16x1xf32, #tpu.memory_space<vmem>>, %arg2: memref<1x16xf32, #tpu.memory_space<vmem>>, %arg3: memref<16x33xf32, #tpu.memory_space<vmem>>) attributes {dimension_semantics = [#tpu.dimension_semantics<parallel>], iteration_bounds = array<i64: 1>, scalar_prefetch = 0 : i64, scratch_operands = 0 : i64, tpu.core_type = #tpu.core_type<tc>, window_params = [{transform_indices = @transform_0, window_bounds = array<i64: 16, 1>}, {pipeline_mode = #tpu.pipeline_mode<synchronous>, transform_indices = @transform_1, window_bounds = array<i64: 1, 16>}, {transform_indices = @transform_2, window_bounds = array<i64: 16, 33>}]} {
    %c0 = arith.constant 0 : index
    %c0_0 = arith.constant 0 : index
    %0 = vector.load %arg1[%c0, %c0_0] : memref<16x1xf32, #tpu.memory_space<vmem>>, vector<16x1xf32>
    %c0_1 = arith.constant 0 : index
    %c0_2 = arith.constant 0 : index
    %1 = vector.load %arg2[%c0_1, %c0_2] : memref<1x16xf32, #tpu.memory_space<vmem>>, vector<1x16xf32>
    %cst = arith.constant 6.28318548 : f32
    %2 = vector.broadcast %cst : f32 to vector<1x16xf32>
    %3 = arith.mulf %1, %2 : vector<1x16xf32>
    %4 = vector.broadcast %0 : vector<16x1xf32> to vector<16x16xf32>
    %5 = vector.broadcast %3 : vector<1x16xf32> to vector<16x16xf32>
    %6 = arith.mulf %4, %5 : vector<16x16xf32>
    %c0_3 = arith.constant 0 : index
    %c0_4 = arith.constant 0 : index
    %7 = vector.load %arg3[%c0_3, %c0_4] : memref<16x33xf32, #tpu.memory_space<vmem>>, vector<16x1xf32>
    tpu.vector_store %arg3[%c0_3, %c0_4], %0 {strides = array<i32>} : memref<16x33xf32, #tpu.memory_space<vmem>>, vector<16x1xf32>,
    %8 = math.sin %6 : vector<16x16xf32>
    %c0_5 = arith.constant 0 : index
    %c1 = arith.constant 1 : index
    %9 = vector.load %arg3[%c0_5, %c1] : memref<16x33xf32, #tpu.memory_space<vmem>>, vector<16x16xf32>
    tpu.vector_store %arg3[%c0_5, %c1], %8 {strides = array<i32>} : memref<16x33xf32, #tpu.memory_space<vmem>>, vector<16x16xf32>,
    %10 = math.cos %6 : vector<16x16xf32>
    %c0_6 = arith.constant 0 : index
    %c17 = arith.constant 17 : index
    %11 = vector.load %arg3[%c0_6, %c17] : memref<16x33xf32, #tpu.memory_space<vmem>>, vector<16x16xf32>
    tpu.vector_store %arg3[%c0_6, %c17], %10 {strides = array<i32>} : memref<16x33xf32, #tpu.memory_space<vmem>>, vector<16x16xf32>,
    return
  }
  func.func @transform_0(%arg0: i32) -> (i32, i32) {
    %c0_i32 = arith.constant 0 : i32
    %c0_i32_0 = arith.constant 0 : i32
    return %arg0, %c0_i32 : i32, i32
  }
  func.func @transform_1(%arg0: i32) -> (i32, i32) {
    %c0_i32 = arith.constant 0 : i32
    %c0_i32_0 = arith.constant 0 : i32
    %c0_i32_1 = arith.constant 0 : i32
    return %c0_i32, %c0_i32_0 : i32, i32
  }
  func.func @transform_2(%arg0: i32) -> (i32, i32) {
    %c0_i32 = arith.constant 0 : i32
    %c0_i32_0 = arith.constant 0 : i32
    return %arg0, %c0_i32 : i32, i32
  }
}

</mosaic_0001>

<bundles_post_ra>
// kernel: tpu_custom_call.1
= control target key start
LH: loop header
LB: loop body
LE: loop exit
PB: predicated region body
PF: predicated region fallthrough
CT: control target
= control target key end

     0   :  { %vm34_vm0 = vcmask 7168   ;;  %v558_v2 = vmov 0   ;;  %s666_s0 = inlined_call_operand.vmem [shape: f32[16,1], index: 0, kind: input, shape index: {}]   ;;  %s667_s1 = inlined_call_operand.vmem [shape: f32[1,16], index: 1, kind: input, shape index: {}]   ;;  %s668_s2 = inlined_call_operand.hbm [shape: f32[16,33], index: 2, kind: output, shape index: {}]  }
   0x1   :  { %v12_v0 = vld [vmem:[%s666_s0] sm:$0xff]  ;;  %v13_v1 = vld [vmem:[%s666_s0 + $0x8] sm:$0xff]  ;;  %525 = vset.pattern.permute.xlu0 %v558_v2 }
   0x2   :  { %35 = vst.msk [vmem:[#allocation2] sm:$0xff] %vm34_vm0, %v12_v0  ;;  %36 = vst.msk [vmem:[#allocation2 + $0x8] sm:$0xff] %vm34_vm0, %v13_v1  ;;  %18 = vperm.xlu0 %525, %v12_v0  }
   0x3   :  { %7 = vsyncpa [#allocation3], 0  ;;  %v27_v3 = vlaneseq  ;;  %v14_v5 = vld [vmem:[%s667_s1] sm:$0x1]  ;;  %v559_v29 = vmov 683565275  }
   0x4   :  { %v15_v6 = vmul.f32 6.2831855, %v14_v5  ;;  %v560_v33 = vmov 2475754826   ;;  %v561_v35 = vmov 2131351028  }
   0x5   :  { %v28_v4 = vshrl.u32 %v27_v3, 7  ;;  %v562_v37 = vmov 2102212464   ;;  %v563_v39 = vmov 920167782   ;;  %s565_s0 = smov 17  }
   0x6   :  { %23 = vperm.xlu0 %525, %v13_v1   ;;  %v564_v46 = vmov 1326507024   ;;  %s566_s1 = smov 1   ;;  %s567_s15 = smov [#allocation2]  }
   0x7   :  { %v29_v7 = vsub.s32 0, %v28_v4  ;;  %s478_s16 = sshll.u32 %s567_s15, 4  ;;  %s479_s16 = int_to_ptr.vmem [resolvable:$true] %s478_s16 }
   0x8   :  { %s534_s17 = scalar_lea.vmem %s479_s16, 256  ;;  %p539_p1 = scmp.lt.s32.totalorder %s479_s16, %s479_s16 }
   0x9   :  { %v30_v8 = vrot.slane %v15_v6, %v29_v7  ;;  %p535_p0 = scmp.ne.s32.totalorder %s479_s16, %s534_s17  ;;  %p540_p2 = scmp.lt.s32.totalorder %s534_s17, %s534_s17 }
   0xb   :  { %p541_p3 = por %p540_p2, %p539_p1 }
   0xd   :  { %p542_p4 = pnand %p541_p3, %p535_p0 }
  0x81   :  { %v19_v9 = vpop.permute.xlu0 %18 }
  0x82   :  { %v594_v10 = vmul.f32 %v30_v8, %v19_v9 }
  0x84   :  { %v37_v11 = vand.u32 2147483647, %v594_v10  ;;  %v40_v12 = vand.u32 2139095040, %v594_v10  ;;  %vm39_vm15 = vcmp.lt.s32.totalorder %v594_v10, 0 }
  0x85   :  { %v24_v13 = vpop.permute.xlu0 %23 }
  0x86   :  { %v41_v14 = vshrl.u32 %v40_v12, 23  ;;  %v598_v15 = vmul.f32 %v30_v8, %v24_v13  ;;  %v44_v16 = vand.u32 8388607, %v37_v11  ;;  %vm38_vm0 = vcmp.le.f32.partialorder %v37_v11, 0.7853982 }
  0x88   :  { %v489_v17 = vadd.s32 4294967169, %v41_v14  ;;  %v144_v18 = vand.u32 2139095040, %v598_v15  ;;  %v45_v20 = vor.u32 8388608, %v44_v16  ;;  %v141_v22 = vand.u32 2147483647, %v598_v15 }
  0x8a   :  { %v47_v19 = vadd.s32 1, %v489_v17  ;;  %v145_v21 = vshrl.u32 %v144_v18, 23  ;;  %v604_v27 = vshll.u32 %v45_v20, 8  ;;  %v148_v31 = vand.u32 8388607, %v141_v22 }
  0x8c   :  { %vm48_vm1 = vcmp.gt.s32.totalorder %v47_v19, 0  ;;  %v493_v24 = vadd.s32 4294967169, %v145_v21  ;;  %v149_v61 = vor.u32 8388608, %v148_v31 }
  0x8d   :  { %v49_v23 = vsel %vm48_vm1, %v47_v19, 0  ;;  %vm143_vm1 = vcmp.lt.s32.totalorder %v598_v15, 0 }
  0x8e   :  { %v50_v25 = vshrl.u32 %v49_v23, 5  ;;  %v51_v26 = vand.u32 31, %v49_v23  ;;  %v151_v32 = vadd.s32 1, %v493_v24  ;;  %v189_v12 = vshll.u32 %v149_v61, 8 }
  0x90   :  { %v52_v28 = vsub.s32 32, %v51_v26  ;;  %v54_v30 = vshll.u32 %v559_v29, %v51_v26  ;;  %v57_v34 = vshll.u32 %v560_v33, %v51_v26  ;;  %v60_v36 = vshll.u32 %v561_v35, %v51_v26 }
  0x91   :  { %v63_v38 = vshll.u32 %v562_v37, %v51_v26  ;;  %v66_v40 = vshll.u32 %v563_v39, %v51_v26  ;;  %vm69_vm2 = vcmp.lt.s32.totalorder %v50_v25, 1  ;;  %vm71_vm3 = vcmp.lt.s32.totalorder %v50_v25, 3 }
  0x92   :  { %v55_v41 = vshrl.u32 %v560_v33, %v52_v28  ;;  %v58_v42 = vshrl.u32 %v561_v35, %v52_v28  ;;  %v61_v43 = vshrl.u32 %v562_v37, %v52_v28  ;;  %v53_v44 = vshrl.u32 %v559_v29, %v52_v28 }
  0x93   :  { %v64_v45 = vshrl.u32 %v563_v39, %v52_v28  ;;  %v67_v47 = vshrl.u32 %v564_v46, %v52_v28  ;;  %vm152_vm4 = vcmp.gt.s32.totalorder %v151_v32, 0  ;;  %vm72_vm5 = vcmp.lt.s32.totalorder %v50_v25, 4 }
  0x94   :  { %v56_v48 = vor.u32 %v55_v41, %v54_v30  ;;  %v59_v49 = vor.u32 %v58_v42, %v57_v34  ;;  %v62_v50 = vor.u32 %v61_v43, %v60_v36  ;;  %v153_v53 = vsel %vm152_vm4, %v151_v32, 0 }
  0x95   :  { %v65_v51 = vor.u32 %v64_v45, %v63_v38  ;;  %v68_v52 = vor.u32 %v67_v47, %v66_v40  ;;  %vm70_vm6 = vcmp.lt.s32.totalorder %v50_v25, 2  ;;  %v155_v0 = vand.u32 31, %v153_v53 }
  0x96   :  { %v73_v54 = vsel %vm69_vm2, %v53_v44, %v56_v48  ;;  %v74_v55 = vsel %vm72_vm5, %v62_v50, 2102212464  ;;  %v77_v56 = vsel %vm69_vm2, %v56_v48, %v59_v49  ;;  %v81_v57 = vsel %vm69_vm2, %v59_v49, %v62_v50 }
  0x97   :  { %v75_v58 = vsel %vm71_vm3, %v59_v49, %v74_v55  ;;  %v78_v59 = vsel %vm72_vm5, %v65_v51, 920167782  ;;  %v82_v60 = vsel %vm72_vm5, %v68_v52, 1326507024  ;;  %v154_v8 = vshrl.u32 %v153_v53, 5 }
  0x98   :  { %v79_v62 = vsel %vm71_vm3, %v62_v50, %v78_v59  ;;  %v83_v63 = vsel %vm71_vm3, %v65_v51, %v82_v60  ;;  %v76_v1 = vsel %vm70_vm6, %v73_v54, %v75_v58  ;;  %v156_v9 = vsub.s32 32, %v155_v0 }
  0x99   :  { %v80_v2 = vsel %vm70_vm6, %v77_v56, %v79_v62  ;;  %v84_v3 = vsel %vm70_vm6, %v81_v57, %v83_v63  ;;  %v92_v13 = vmul.u32 %v604_v27, %v76_v1  ;;  %v158_v14 = vshll.u32 %v559_v29, %v155_v0 }
  0x9a   :  { %v617_v4 = vmul.u32.u64.low %v604_v27, %v84_v3  ;;  %v618_v5 = vmul.u32.u64.high %v604_v27, %v84_v3, %v617_v4  ;;  %v621_v6 = vmul.u32.u64.low %v604_v27, %v80_v2  ;;  %v622_v7 = vmul.u32.u64.high %v604_v27, %v80_v2, %v621_v6 }
  0x9b   :  { %v161_v16 = vshll.u32 %v560_v33, %v155_v0  ;;  %v164_v17 = vshll.u32 %v561_v35, %v155_v0  ;;  %v159_v18 = vshrl.u32 %v560_v33, %v156_v9  ;;  %v162_v19 = vshrl.u32 %v561_v35, %v156_v9 }
  0x9c   :  { %v165_v20 = vshrl.u32 %v562_v37, %v156_v9  ;;  %v167_v21 = vshll.u32 %v562_v37, %v155_v0  ;;  %vm94_vm7 = vc.u32 %v618_v5, %v621_v6  ;;  %v95_v23 = vadd.s32 1, %v622_v7 }
  0x9d   :  { %v168_v24 = vshrl.u32 %v563_v39, %v156_v9  ;;  %v170_v25 = vshll.u32 %v563_v39, %v155_v0  ;;  %v160_v26 = vor.u32 %v159_v18, %v158_v14  ;;  %v163_v28 = vor.u32 %v162_v19, %v161_v16 }
  0x9e   :  { %v166_v30 = vor.u32 %v165_v20, %v164_v17  ;;  %v171_v31 = vshrl.u32 %v564_v46, %v156_v9  ;;  %v96_v27 = vsel %vm94_vm7, %v95_v23, %v622_v7  ;;  %vm173_vm8 = vcmp.lt.s32.totalorder %v154_v8, 1 }
  0x9f   :  { %v169_v32 = vor.u32 %v168_v24, %v167_v21  ;;  %vm176_vm9 = vcmp.lt.s32.totalorder %v154_v8, 4  ;;  %v97_v33 = vadd.s32 %v96_v27, %v92_v13  ;;  %vm175_vm10 = vcmp.lt.s32.totalorder %v154_v8, 3 }
  0xa0   :  { %v172_v34 = vor.u32 %v171_v31, %v170_v25  ;;  %v178_v35 = vsel %vm176_vm9, %v166_v30, 2102212464  ;;  %v157_v36 = vshrl.u32 %v559_v29, %v156_v9  ;;  %v181_v37 = vsel %vm173_vm8, %v160_v26, %v163_v28 }
  0xa1   :  { %v182_v38 = vsel %vm176_vm9, %v169_v32, 920167782  ;;  %v185_v40 = vsel %vm173_vm8, %v163_v28, %v166_v30  ;;  %v98_v41 = vadd.s32 536870912, %v97_v33  ;;  %vm174_vm11 = vcmp.lt.s32.totalorder %v154_v8, 2 }
  0xa2   :  { %v183_v39 = vsel %vm175_vm10, %v166_v30, %v182_v38  ;;  %v186_v42 = vsel %vm176_vm9, %v172_v34, 1326507024  ;;  %v177_v43 = vsel %vm173_vm8, %v157_v36, %v160_v26  ;;  %v179_v44 = vsel %vm175_vm10, %v163_v28, %v178_v35 }
  0xa3   :  { %v184_v45 = vsel %vm174_vm11, %v181_v37, %v183_v39  ;;  %v187_v46 = vsel %vm175_vm10, %v169_v32, %v186_v42  ;;  %v99_v47 = vshrl.u32 %v98_v41, 30  ;;  %v180_v53 = vsel %vm174_vm11, %v177_v43, %v179_v44 }
  0xa4   :  { %v188_v48 = vsel %vm174_vm11, %v185_v40, %v187_v46  ;;  %v632_v49 = vmul.u32.u64.low %v189_v12, %v184_v45  ;;  %v633_v50 = vmul.u32.u64.high %v189_v12, %v184_v45, %v632_v49  ;;  %v196_v56 = vmul.u32 %v189_v12, %v180_v53 }
  0xa5   :  { %v635_v51 = vmul.u32.u64.low %v189_v12, %v188_v48  ;;  %v636_v52 = vmul.u32.u64.high %v189_v12, %v188_v48, %v635_v51  ;;  %v100_v29 = vshll.u32 %v99_v47, 30  ;;  %v93_v4 = vadd.s32 %v621_v6, %v618_v5 }
  0xa6   :  { %v199_v55 = vadd.s32 1, %v633_v50  ;;  %v123_v28 = vsub.s32 4, %v99_v47  ;;  %vm142_vm2 = vcmp.le.f32.partialorder %v141_v22, 0.7853982  ;;  %vm129_vm9 = vweird.f32 %v594_v10 }
  0xa7   :  { %v101_v54 = vsub.s32 %v97_v33, %v100_v29  ;;  %vm198_vm12 = vc.u32 %v636_v52, %v632_v49  ;;  %v197_v5 = vadd.s32 %v632_v49, %v636_v52 }
  0xa8   :  { %v200_v58 = vsel %vm198_vm12, %v199_v55, %v633_v50  ;;  %v124_v35 = vsel %vm39_vm15, %v123_v28, %v99_v47 }
  0xa9   :  { %v103_v57 = vsub.s32 0, %v101_v54  ;;  %v201_v59 = vadd.s32 %v200_v58, %v196_v56  ;;  %v126_v41 = vsel %vm38_vm0, 0, %v124_v35 }
  0xaa   :  { %v130_v43 = vadd.s32 3, %v126_v41  ;;  %v349_v48 = vand.u32 3, %v126_v41 }
  0xab   :  { %v490_v60 = vmin.u32 %v103_v57, %v101_v54  ;;  %v202_v61 = vadd.s32 536870912, %v201_v59 }
  0xac   :  { %v131_v49 = vand.u32 3, %v130_v43  ;;  %vm354_vm3 = vcmp.eq.s32.totalorder %v349_v48, 2  ;;  %vm351_vm5 = vcmp.eq.s32.totalorder %v349_v48, 0  ;;  %vm350_vm7 = vcmp.lt.s32.totalorder %v349_v48, 2 }
  0xad   :  { %v105_v62 = vclz %v490_v60  ;;  %v203_v63 = vshrl.u32 %v202_v61, 30 }
  0xae   :  { %vm136_vm4 = vcmp.eq.s32.totalorder %v131_v49, 2  ;;  %vm133_vm6 = vcmp.eq.s32.totalorder %v131_v49, 0  ;;  %vm132_vm8 = vcmp.lt.s32.totalorder %v131_v49, 2 }
  0xaf   :  { %v491_v0 = vadd.s32 4294967294, %v105_v62  ;;  %v204_v1 = vshll.u32 %v203_v63, 30  ;;  %v227_v45 = vsub.s32 4, %v203_v63 }
  0xb1   :  { %vm492_vm13 = vcmp.lt.s32.totalorder %v491_v0, 0  ;;  %v205_v3 = vsub.s32 %v201_v59, %v204_v1  ;;  %v228_v47 = vsel %vm143_vm1, %v227_v45, %v203_v63 }
  0xb2   :  { %v108_v2 = vsel %vm492_vm13, 0, %v491_v0 }
  0xb3   :  { %v109_v7 = vsub.s32 32, %v108_v2  ;;  %v113_v8 = vsub.s32 4294967266, %v108_v2  ;;  %v207_v9 = vsub.s32 0, %v205_v3  ;;  %v110_v12 = vshll.u32 %v101_v54, %v108_v2 }
  0xb4   :  { %v230_v54 = vsel %vm142_vm2, 0, %v228_v47 }
  0xb5   :  { %v111_v13 = vshrl.u32 %v93_v4, %v109_v7  ;;  %v114_v14 = vadd.s32 127, %v113_v8  ;;  %v494_v16 = vmin.u32 %v207_v9, %v205_v3  ;;  %v234_v60 = vadd.s32 3, %v230_v54 }
  0xb6   :  { %v452_v0 = vand.u32 3, %v230_v54 }
  0xb7   :  { %v112_v17 = vor.u32 %v111_v13, %v110_v12  ;;  %v115_v18 = vshll.u32 %v114_v14, 23  ;;  %v209_v19 = vclz %v494_v16  ;;  %v235_v63 = vand.u32 3, %v234_v60 }
  0xb8   :  { %vm454_vm12 = vcmp.eq.s32.totalorder %v452_v0, 0  ;;  %vm457_vm13 = vcmp.eq.s32.totalorder %v452_v0, 2 }
  0xb9   :  { %v116_v20 = vor.u32 4788187, %v115_v18  ;;  %v495_v21 = vadd.s32 4294967294, %v209_v19  ;;  %v119_v24 = vcvt.s32.f32 %v112_v17  ;;  %vm240_vm10 = vcmp.eq.s32.totalorder %v235_v63, 2 }
  0xba   :  { %vm237_vm11 = vcmp.eq.s32.totalorder %v235_v63, 0 }
  0xbb   :  { %v117_v23 = vand.u32 2147483647, %v116_v20  ;;  %vm496_vm14 = vcmp.lt.s32.totalorder %v495_v21, 0 }
  0xbc   :  { %v212_v26 = vsel %vm496_vm14, 0, %v495_v21  ;;  %vm236_vm14 = vcmp.lt.s32.totalorder %v235_v63, 2 }
  0xbd   :  { %v120_v25 = vmul.f32 %v119_v24, %v117_v23  ;;  %v213_v6 = vsub.s32 32, %v212_v26  ;;  %v217_v30 = vsub.s32 4294967266, %v212_v26  ;;  %v214_v27 = vshll.u32 %v205_v3, %v212_v26 }
  0xbf   :  { %v121_v31 = vxor.u32 2147483648, %v120_v25  ;;  %v215_v32 = vshrl.u32 %v197_v5, %v213_v6  ;;  %v218_v33 = vadd.s32 127, %v217_v30 }
  0xc1   :  { %v122_v34 = vsel %vm39_vm15, %v121_v31, %v120_v25  ;;  %v216_v36 = vor.u32 %v215_v32, %v214_v27  ;;  %v219_v37 = vshll.u32 %v218_v33, 23  ;;  %vm233_vm15 = vweird.f32 %v598_v15 }
  0xc2   :  { %v125_v38 = vsel %vm38_vm0, %v594_v10, %v122_v34  ;;  %vm453_vm0 = vcmp.lt.s32.totalorder %v452_v0, 2 }
  0xc3   :  { %526 = vcosq.f32 %v125_v38  ;;  %v220_v40 = vor.u32 4788187, %v219_v37  ;;  %v223_v42 = vcvt.s32.f32 %v216_v36 }
  0xc4   :  { %528 = vsinq.f32 %v125_v38 }
  0xc5   :  { %v221_v39 = vand.u32 2147483647, %v220_v40 }
  0xc7   :  { %v224_v44 = vmul.f32 %v223_v42, %v221_v39 }
  0xc9   :  { %v225_v46 = vxor.u32 2147483648, %v224_v44 }
  0xcb   :  { %v226_v11 = vsel %vm143_vm1, %v225_v46, %v224_v44  ;;  %vm253_vm1 = vcmask 138248  }
  0xcc   :  { %v229_v51 = vsel %vm142_vm2, %v598_v15, %v226_v11  ;;  %vm470_vm2 = vcmask 269448  }
  0xcd   :  { %v527_v50 = vpop.eup %526  ;;  %530 = vcosq.f32 %v229_v51 }
  0xce   :  { %v529_v52 = vpop.eup %528  ;;  %v137_v29 = vxor.u32 2147483648, %v527_v50  ;;  %532 = vsinq.f32 %v229_v51 }
  0xcf   :  { %v134_v53 = vxor.u32 2147483648, %v529_v52 }
  0xd0   :  { %v356_v55 = vsel %vm354_vm3, %v137_v29, %v529_v52  ;;  %v138_v56 = vsel %vm136_vm4, %v137_v29, %v529_v52 }
  0xd1   :  { %v353_v57 = vsel %vm351_vm5, %v527_v50, %v134_v53  ;;  %v135_v22 = vsel %vm133_vm6, %v527_v50, %v134_v53 }
  0xd2   :  { %v357_v58 = vsel %vm350_vm7, %v353_v57, %v356_v55  ;;  %v139_v59 = vsel %vm132_vm8, %v135_v22, %v138_v56 }
  0xd3   :  { %v358_v61 = vsel %vm129_vm9, nan, %v357_v58  ;;  %v140_v62 = vsel %vm129_vm9, nan, %v139_v59 }
  0xd4   :  { %464 = vrot.lane.b32.xlu0 %v358_v61, %s565_s0  ;;  %247 = vrot.lane.b32.xlu1 %v140_v62, %s566_s1 }
  0xd7   :  { %v531_v1 = vpop.eup %530 }
  0xd8   :  { %v533_v2 = vpop.eup %532  ;;  %v241_v3 = vxor.u32 2147483648, %v531_v1 }
  0xd9   :  { %v238_v4 = vxor.u32 2147483648, %v533_v2 }
  0xda   :  { %v242_v7 = vsel %vm240_vm10, %v241_v3, %v533_v2  ;;  %v459_v9 = vsel %vm457_vm13, %v241_v3, %v533_v2 }
  0xdb   :  { %v239_v10 = vsel %vm237_vm11, %v531_v1, %v238_v4  ;;  %v456_v8 = vsel %vm454_vm12, %v531_v1, %v238_v4 }
  0xdc   :  { %v243_v12 = vsel %vm236_vm14, %v239_v10, %v242_v7  ;;  %v460_v14 = vsel %vm453_vm0, %v456_v8, %v459_v9 }
  0xdd   :  { %v244_v13 = vsel %vm233_vm15, nan, %v243_v12  ;;  %v461_v16 = vsel %vm233_vm15, nan, %v460_v14 }
  0xde   :  { %249 = vrot.lane.b32.xlu1 %v244_v13, %s566_s1 }
  0xe2   :  { %466 = vrot.lane.b32.xlu1 %v461_v16, %s565_s0 }
 0x146   :  { %v248_v17 = vpop.permute.xlu1 %247  ;;  %v465_v18 = vpop.permute.xlu0 %464 }
 0x147   :  { %254 = vst.msk [vmem:[#allocation2] sm:$0xff] %vm253_vm1, %v248_v17 }
 0x148   :  { %471 = vst.msk [vmem:[#allocation2] sm:$0xff] %vm470_vm2, %v465_v18 }
 0x150   :  { %v250_v19 = vpop.permute.xlu1 %249 }
 0x151   :  { %255 = vst.msk [vmem:[#allocation2 + $0x8] sm:$0xff] %vm253_vm1, %v250_v19 }
 0x154   :  { %v467_v20 = vpop.permute.xlu1 %466 }
 0x155   :  { %472 = vst.msk [vmem:[#allocation2 + $0x8] sm:$0xff] %vm470_vm2, %v467_v20 }
 0x156   :  { %545 = shalt.err (!%p542_p4)
}
 0x157   :  { %s546_s20 = scalar_lea.hbm %s668_s2, 256 }
 0x158   :  { %p547_p5 = scmp.ne.s32.totalorder %s668_s2, %s546_s20  ;;  %p550_p6 = scmp.lt.u32.totalorder %s546_s20, %s668_s2 }
 0x15a   :  { %p552_p7 = pnand %p550_p6, %p547_p5 }
 0x15c   :  { %555 = shalt.err (!%p552_p7)
}
 0x15d   :  { %s568_s25 = smov 128   ;;  %s569_s26 = smov 8  }
 0x15e   :  { %484 = dma.vmem_to_hbm [thread:$0]  %s479_s16, 256, %s668_s2, [#allocation3], %s568_s25, %s568_s25, %s569_s26  }
 0x15f   :  { %556 = dma.done.wait [#allocation3], 256  }
 0x160   :  { %557 = vsyncadd [#allocation3], 4294967040 }
 0x161   :  { %488 = vsyncpa [#allocation3], 1 }

</bundles_post_ra>
